<compile_context>
chip_gen: v7x
topology: tpu7x:2x2x1
jax: 0.10.0
libtpu: 0.0.40
codegen_flags: <defaults>
</compile_context>

<pallas_src>
import functools

import jax
import jax.numpy as jnp
from jax.experimental import pallas as pl
from jax.experimental.pallas import tpu as pltpu

HIDDEN_DIM = 128
LANE = 128


def _nb_decoder_kernel(z_ref, w1_ref, b1_ref, w2_ref, b2_ref, w3_ref, b3_ref,
                       out_ref, *, output_dim):
    # Layer 1: Linear(z_dim -> 128) + ReLU.   bf16 matmul, f32 accumulation.
    h1 = jnp.dot(z_ref[...], w1_ref[...], preferred_element_type=jnp.float32)
    h1 = jnp.maximum(h1 + b1_ref[...], 0.0)
    # Layer 2: Linear(128 -> 128) + ReLU.
    h2 = jnp.dot(h1.astype(jnp.bfloat16), w2_ref[...],
                 preferred_element_type=jnp.float32)
    h2 = jnp.maximum(h2 + b2_ref[...], 0.0)
    # Layer 3: single lane-dense head, (128 -> padded 2*output_dim).
    p = jnp.dot(h2.astype(jnp.bfloat16), w3_ref[...],
                preferred_element_type=jnp.float32) + b3_ref[...]
    # Columns [0, output_dim) are the NB logits; the rest get softplus(x)+1e-7
    # (the zero-padded tail columns are sliced off in the wrapper).
    col = jax.lax.broadcasted_iota(jnp.int32, p.shape, 1)
    out_ref[...] = jnp.where(col < output_dim, p, jax.nn.softplus(p) + 1e-7)


def _round_up(x, m):
    return ((x + m - 1) // m) * m


def _choose_tile_m(n):
    # Big enough to amortize per-grid-step overhead, small enough that
    # 2x double-buffered (z, out) tiles + two (TILE_M,128) f32 intermediates
    # fit comfortably inside v5e's 16 MiB / v7x's 32 MiB scoped VMEM.
    for t in (2048, 1024, 512, 256, 128, 64, 32, 16, 8):
        if n >= t:
            return t
    return 8


def nb_node_decoder(z, params):
    """Fused Nb_NodeDecoder forward.  Returns (log_p, r) = NB(logits, total_count).

    # TODO(synk): torch.distributions.Independent(NegativeBinomial(...), 1) object
    # construction has no Pallas equivalent; the distribution parameters are returned.
    """
    w1, b1, w2, b2, w3, b3 = params
    n, z_dim = z.shape
    out_cols = w3.shape[1]
    output_dim = out_cols // 2
    padded_cols = max(LANE, _round_up(out_cols, LANE))

    # Zero-pad the final layer to a lane-dense (multiple-of-128) output width so
    # output stores are unmasked and the head matmul fills the MXU columns.
    w3p = jnp.pad(w3, ((0, 0), (0, padded_cols - out_cols)))
    b3p = jnp.pad(b3.reshape(1, -1), ((0, 0), (0, padded_cols - out_cols)))

    # bf16 matmul operands, f32 biases/activations.
    z_bf16 = z.astype(jnp.bfloat16)
    w1_bf16 = w1.astype(jnp.bfloat16)
    w2_bf16 = w2.astype(jnp.bfloat16)
    w3_bf16 = w3p.astype(jnp.bfloat16)
    b1f = b1.reshape(1, -1).astype(jnp.float32)
    b2f = b2.reshape(1, -1).astype(jnp.float32)
    b3f = b3p.astype(jnp.float32)

    tile_m = _choose_tile_m(n)
    grid = (pl.cdiv(n, tile_m),)
    const = lambda i: (0, 0)

    flops = 2 * n * (z_dim * HIDDEN_DIM + HIDDEN_DIM * HIDDEN_DIM
                     + HIDDEN_DIM * padded_cols)
    bytes_accessed = (z_bf16.size * 2 + w1_bf16.size * 2 + w2_bf16.size * 2
                      + w3_bf16.size * 2
                      + (b1f.size + b2f.size + b3f.size) * 4
                      + n * padded_cols * 4)

    out = pl.pallas_call(
        functools.partial(_nb_decoder_kernel, output_dim=output_dim),
        out_shape=jax.ShapeDtypeStruct((n, padded_cols), jnp.float32),
        grid=grid,
        in_specs=[
            pl.BlockSpec((tile_m, z_dim), lambda i: (i, 0)),   # z: streamed per tile
            pl.BlockSpec((z_dim, HIDDEN_DIM), const),          # w1: VMEM-resident
            pl.BlockSpec((1, HIDDEN_DIM), const),              # b1
            pl.BlockSpec((HIDDEN_DIM, HIDDEN_DIM), const),     # w2
            pl.BlockSpec((1, HIDDEN_DIM), const),              # b2
            pl.BlockSpec((HIDDEN_DIM, padded_cols), const),    # w3 (merged + padded)
            pl.BlockSpec((1, padded_cols), const),             # b3 (merged + padded)
        ],
        out_specs=pl.BlockSpec((tile_m, padded_cols), lambda i: (i, 0)),
        compiler_params=pltpu.CompilerParams(
            dimension_semantics=("parallel",)),  # megacore on v7x; no-op elsewhere
        cost_estimate=pl.CostEstimate(
            flops=flops,
            transcendentals=n * padded_cols,
            bytes_accessed=bytes_accessed),
    )(z_bf16, w1_bf16, b1f, w2_bf16, b2f, w3_bf16, b3f)

    log_p = out[:, :output_dim]
    r = out[:, output_dim:out_cols]
    return log_p, r


def init_params(key, z_dim, output_dim):
    """Deterministic synthetic parameters (shapes match the PyTorch module;
    biases are 1-D like torch.nn.Linear)."""
    ks = jax.random.split(key, 6)
    s1 = 1.0 / jnp.sqrt(z_dim)
    s2 = 1.0 / jnp.sqrt(HIDDEN_DIM)
    w1 = jax.random.uniform(ks[0], (z_dim, HIDDEN_DIM), jnp.float32, -s1, s1)
    b1 = jax.random.uniform(ks[1], (HIDDEN_DIM,), jnp.float32, -s1, s1)
    w2 = jax.random.uniform(ks[2], (HIDDEN_DIM, HIDDEN_DIM), jnp.float32, -s2, s2)
    b2 = jax.random.uniform(ks[3], (HIDDEN_DIM,), jnp.float32, -s2, s2)
    w3 = jax.random.uniform(ks[4], (HIDDEN_DIM, 2 * output_dim), jnp.float32, -s2, s2)
    b3 = jax.random.uniform(ks[5], (2 * output_dim,), jnp.float32, -s2, s2)
    return w1, b1, w2, b2, w3, b3


def reference(z, params, output_dim):
    w1, b1, w2, b2, w3, b3 = params
    h1 = jnp.maximum(z @ w1 + b1, 0.0)
    h2 = jnp.maximum(h1 @ w2 + b2, 0.0)
    p = h2 @ w3 + b3
    log_p = p[:, :output_dim]
    r = jax.nn.softplus(p[:, output_dim:]) + 1e-7
    return log_p, r


if __name__ == "__main__":
    key = jax.random.PRNGKey(0)
    k_z, k_p = jax.random.split(key)

    n_nodes = 24       # small batch; exercises a multi-step grid with a partial tile
    z_dim = 32         # latent dim
    output_dim = 16    # decoder output dim

    z = jax.random.normal(k_z, (n_nodes, z_dim), jnp.float32)
    params = init_params(k_p, z_dim, output_dim)

    log_p, r = nb_node_decoder(z, params)
    jax.block_until_ready((log_p, r))

    ref_log_p, ref_r = reference(z, params, output_dim)
    # bf16 matmul inputs (f32 accumulation) -> loosen tolerance vs. the f32 reference.
    assert jnp.allclose(log_p, ref_log_p, atol=3e-2, rtol=3e-2), "log_p mismatch"
    assert jnp.allclose(r, ref_r, atol=3e-2, rtol=3e-2), "r mismatch"
    assert bool(jnp.all(r > 0)), "total_count must be strictly positive"

    print("KERNEL_OK")
</pallas_src>

<mosaic_0001>
module attributes {stable_mosaic.version = 11 : i64} {
  func.func @_nb_decoder_kernel(%arg0: i32, %arg1: memref<16x32xbf16, #tpu.memory_space<vmem>>, %arg2: memref<32x128xbf16, #tpu.memory_space<vmem>>, %arg3: memref<1x128xf32, #tpu.memory_space<vmem>>, %arg4: memref<128x128xbf16, #tpu.memory_space<vmem>>, %arg5: memref<1x128xf32, #tpu.memory_space<vmem>>, %arg6: memref<128x128xbf16, #tpu.memory_space<vmem>>, %arg7: memref<1x128xf32, #tpu.memory_space<vmem>>, %arg8: memref<16x128xf32, #tpu.memory_space<vmem>>) attributes {dimension_semantics = [#tpu.dimension_semantics<parallel>], iteration_bounds = array<i64: 2>, scalar_prefetch = 0 : i64, scratch_operands = 0 : i64, tpu.core_type = #tpu.core_type<tc>, window_params = [{transform_indices = @transform_0, window_bounds = array<i64: 16, 32>}, {pipeline_mode = #tpu.pipeline_mode<synchronous>, transform_indices = @transform_1, window_bounds = array<i64: 32, 128>}, {pipeline_mode = #tpu.pipeline_mode<synchronous>, transform_indices = @transform_2, window_bounds = array<i64: 1, 128>}, {pipeline_mode = #tpu.pipeline_mode<synchronous>, transform_indices = @transform_3, window_bounds = array<i64: 128, 128>}, {pipeline_mode = #tpu.pipeline_mode<synchronous>, transform_indices = @transform_4, window_bounds = array<i64: 1, 128>}, {pipeline_mode = #tpu.pipeline_mode<synchronous>, transform_indices = @transform_5, window_bounds = array<i64: 128, 128>}, {pipeline_mode = #tpu.pipeline_mode<synchronous>, transform_indices = @transform_6, window_bounds = array<i64: 1, 128>}, {transform_indices = @transform_7, window_bounds = array<i64: 16, 128>}]} {
    %c0 = arith.constant 0 : index
    %c0_0 = arith.constant 0 : index
    %0 = vector.load %arg1[%c0, %c0_0] : memref<16x32xbf16, #tpu.memory_space<vmem>>, vector<16x32xbf16>
    %c0_1 = arith.constant 0 : index
    %c0_2 = arith.constant 0 : index
    %1 = vector.load %arg2[%c0_1, %c0_2] : memref<32x128xbf16, #tpu.memory_space<vmem>>, vector<32x128xbf16>
    %cst = arith.constant dense<0.000000e+00> : vector<16x128xf32>
    %2 = tpu.matmul %0, %1, %cst {dimension_numbers = #tpu.dot_dimension_numbers<[1], [0], [0], [1], [0, 0, 1, 1], [], []>} : vector<16x32xbf16>, vector<32x128xbf16>, vector<16x128xf32> -> vector<16x128xf32>
    %c0_3 = arith.constant 0 : index
    %c0_4 = arith.constant 0 : index
    %3 = vector.load %arg3[%c0_3, %c0_4] : memref<1x128xf32, #tpu.memory_space<vmem>>, vector<1x128xf32>
    %4 = vector.broadcast %3 : vector<1x128xf32> to vector<16x128xf32>
    %5 = arith.addf %2, %4 : vector<16x128xf32>
    %cst_5 = arith.constant 0.000000e+00 : f32
    %6 = vector.broadcast %cst_5 : f32 to vector<16x128xf32>
    %7 = arith.maximumf %5, %6 : vector<16x128xf32>
    %8 = arith.truncf %7 : vector<16x128xf32> to vector<16x128xbf16>
    %c0_6 = arith.constant 0 : index
    %c0_7 = arith.constant 0 : index
    %9 = vector.load %arg4[%c0_6, %c0_7] : memref<128x128xbf16, #tpu.memory_space<vmem>>, vector<128x128xbf16>
    %cst_8 = arith.constant dense<0.000000e+00> : vector<16x128xf32>
    %10 = tpu.matmul %8, %9, %cst_8 {dimension_numbers = #tpu.dot_dimension_numbers<[1], [0], [0], [1], [0, 0, 1, 1], [], []>} : vector<16x128xbf16>, vector<128x128xbf16>, vector<16x128xf32> -> vector<16x128xf32>
    %c0_9 = arith.constant 0 : index
    %c0_10 = arith.constant 0 : index
    %11 = vector.load %arg5[%c0_9, %c0_10] : memref<1x128xf32, #tpu.memory_space<vmem>>, vector<1x128xf32>
    %12 = vector.broadcast %11 : vector<1x128xf32> to vector<16x128xf32>
    %13 = arith.addf %10, %12 : vector<16x128xf32>
    %cst_11 = arith.constant 0.000000e+00 : f32
    %14 = vector.broadcast %cst_11 : f32 to vector<16x128xf32>
    %15 = arith.maximumf %13, %14 : vector<16x128xf32>
    %16 = arith.truncf %15 : vector<16x128xf32> to vector<16x128xbf16>
    %c0_12 = arith.constant 0 : index
    %c0_13 = arith.constant 0 : index
    %17 = vector.load %arg6[%c0_12, %c0_13] : memref<128x128xbf16, #tpu.memory_space<vmem>>, vector<128x128xbf16>
    %cst_14 = arith.constant dense<0.000000e+00> : vector<16x128xf32>
    %18 = tpu.matmul %16, %17, %cst_14 {dimension_numbers = #tpu.dot_dimension_numbers<[1], [0], [0], [1], [0, 0, 1, 1], [], []>} : vector<16x128xbf16>, vector<128x128xbf16>, vector<16x128xf32> -> vector<16x128xf32>
    %c0_15 = arith.constant 0 : index
    %c0_16 = arith.constant 0 : index
    %19 = vector.load %arg7[%c0_15, %c0_16] : memref<1x128xf32, #tpu.memory_space<vmem>>, vector<1x128xf32>
    %20 = vector.broadcast %19 : vector<1x128xf32> to vector<16x128xf32>
    %21 = arith.addf %18, %20 : vector<16x128xf32>
    %22 = tpu.iota {dimensions = array<i32: 1>} : vector<16x128xi32>
    %c16_i32 = arith.constant 16 : i32
    %23 = vector.broadcast %c16_i32 : i32 to vector<16x128xi32>
    %24 = arith.cmpi slt, %22, %23 : vector<16x128xi32>
    %cst_17 = arith.constant 0.000000e+00 : f32
    %25 = vector.broadcast %cst_17 : f32 to vector<16x128xf32>
    %26 = arith.maximumf %21, %25 : vector<16x128xf32>
    %27 = vector.broadcast %cst_17 : f32 to vector<16x128xf32>
    %28 = arith.subf %21, %27 : vector<16x128xf32>
    %29 = arith.cmpf one, %28, %28 : vector<16x128xf32>
    %30 = vector.broadcast %cst_17 : f32 to vector<16x128xf32>
    %31 = arith.addf %21, %30 : vector<16x128xf32>
    %32 = math.absf %28 : vector<16x128xf32>
    %cst_18 = arith.constant 0.000000e+00 : f32
    %33 = vector.broadcast %cst_18 : f32 to vector<16x128xf32>
    %34 = arith.subf %33, %32 : vector<16x128xf32>
    %35 = math.exp %34 : vector<16x128xf32>
    %36 = math.log1p %35 : vector<16x128xf32>
    %37 = arith.addf %26, %36 : vector<16x128xf32>
    %38 = arith.select %29, %31, %37 : vector<16x128xi1>, vector<16x128xf32>
    %cst_19 = arith.constant 1.000000e-07 : f32
    %39 = vector.broadcast %cst_19 : f32 to vector<16x128xf32>
    %40 = arith.addf %38, %39 : vector<16x128xf32>
    %41 = arith.select %24, %21, %40 : vector<16x128xi1>, vector<16x128xf32>
    %c0_20 = arith.constant 0 : index
    %c0_21 = arith.constant 0 : index
    %42 = vector.load %arg8[%c0_20, %c0_21] : memref<16x128xf32, #tpu.memory_space<vmem>>, vector<16x128xf32>
    tpu.vector_store %arg8[%c0_20, %c0_21], %41 {strides = array<i32>} : memref<16x128xf32, #tpu.memory_space<vmem>>, vector<16x128xf32>,
    return
  }
  func.func @transform_0(%arg0: i32) -> (i32, i32) {
    %c0_i32 = arith.constant 0 : i32
    %c0_i32_0 = arith.constant 0 : i32
    return %arg0, %c0_i32 : i32, i32
  }
  func.func @transform_1(%arg0: i32) -> (i32, i32) {
    %c0_i32 = arith.constant 0 : i32
    %c0_i32_0 = arith.constant 0 : i32
    %c0_i32_1 = arith.constant 0 : i32
    return %c0_i32, %c0_i32_0 : i32, i32
  }
  func.func @transform_2(%arg0: i32) -> (i32, i32) {
    %c0_i32 = arith.constant 0 : i32
    %c0_i32_0 = arith.constant 0 : i32
    %c0_i32_1 = arith.constant 0 : i32
    return %c0_i32, %c0_i32_0 : i32, i32
  }
  func.func @transform_3(%arg0: i32) -> (i32, i32) {
    %c0_i32 = arith.constant 0 : i32
    %c0_i32_0 = arith.constant 0 : i32
    %c0_i32_1 = arith.constant 0 : i32
    return %c0_i32, %c0_i32_0 : i32, i32
  }
  func.func @transform_4(%arg0: i32) -> (i32, i32) {
    %c0_i32 = arith.constant 0 : i32
    %c0_i32_0 = arith.constant 0 : i32
    %c0_i32_1 = arith.constant 0 : i32
    return %c0_i32, %c0_i32_0 : i32, i32
  }
  func.func @transform_5(%arg0: i32) -> (i32, i32) {
    %c0_i32 = arith.constant 0 : i32
    %c0_i32_0 = arith.constant 0 : i32
    %c0_i32_1 = arith.constant 0 : i32
    return %c0_i32, %c0_i32_0 : i32, i32
  }
  func.func @transform_6(%arg0: i32) -> (i32, i32) {
    %c0_i32 = arith.constant 0 : i32
    %c0_i32_0 = arith.constant 0 : i32
    %c0_i32_1 = arith.constant 0 : i32
    return %c0_i32, %c0_i32_0 : i32, i32
  }
  func.func @transform_7(%arg0: i32) -> (i32, i32) {
    %c0_i32 = arith.constant 0 : i32
    %c0_i32_0 = arith.constant 0 : i32
    return %arg0, %c0_i32 : i32, i32
  }
}

</mosaic_0001>

<bundles_post_ra>
// kernel: tpu_custom_call.1
= control target key start
LH: loop header
LB: loop body
LE: loop exit
PB: predicated region body
PF: predicated region fallthrough
CT: control target
= control target key end

     0   :  { %s1608_s0 = inlined_call_operand.hbm [shape: bf16[24,32], index: 0, kind: input, shape index: {}]   ;;  %s1609_s1 = inlined_call_operand.hbm [shape: bf16[32,128], index: 1, kind: input, shape index: {}]   ;;  %s1610_s2 = inlined_call_operand.vmem [shape: f32[1,128], index: 2, kind: input, shape index: {}]   ;;  %s1611_s3 = inlined_call_operand.hbm [shape: bf16[128,128], index: 3, kind: input, shape index: {}]   ;;  %s1612_s4 = inlined_call_operand.vmem [shape: f32[1,128], index: 4, kind: input, shape index: {}]   ;;  %s1613_s5 = inlined_call_operand.hbm [shape: bf16[128,128], index: 5, kind: input, shape index: {}]   ;;  %s1614_s6 = inlined_call_operand.vmem [shape: f32[1,128], index: 6, kind: input, shape index: {}]   ;;  %s1615_s7 = inlined_call_operand.hbm [shape: f32[24,128], index: 7, kind: output, shape index: {}]  }
   0x1   :  { %1623 = sst [smem:[#allocation19_spill]] %s1609_s1 }
   0x2   :  { %12 = vsyncpa [#allocation3], 0 }
   0x3   :  { %14 = vsyncpa [#allocation3 + $0x1], 0 }
   0x4   :  { %15 = vsyncpa [#allocation6], 0 }
   0x5   :  { %16 = vsyncpa [#allocation9], 0 }
   0x6   :  { %17 = vsyncpa [#allocation4], 0 }
   0x7   :  { %19 = vsyncpa [#allocation4 + $0x1], 0  ;;  %s1298_s24 = smov 0   ;;  %s1300_s25 = smov 0  }
   0x8   :  { %s1302_s26 = smov 0   ;;  %s1304_s27 = smov 0  }
   0x9 LB: > { %1624 = sst [smem:[#allocation15_spill]] %s1231_s24  ;;  %s1319_s28 = sadd.s32 4294967295, %s1243_s27   ;;  %s1243_s27 = sphi %s1304_s27, %s1647_s27   ;;  %s1239_s26 = sphi %s1302_s26, %s1651_s26   ;;  %s1235_s25 = sphi %s1300_s25, %s1650_s25   ;;  %s1231_s24 = sphi %s1298_s24, %s1649_s24  }
   0xa   : > { %s830_s29 = sadd.s32 4294967294, %s1243_s27   ;;  %s1323_s30 = sadd.s32 1, %s1243_s27  }
   0xb   : > { %1625 = sst [smem:[#allocation16_spill]] %s1323_s30  ;;  %s32_s8 = sadd.s32 1, %s1239_s26 }
   0xc   : > { %s29_s9 = ssub.s32 %s1243_s27, %s1323_s30  ;;  %p39_p0 = scmp.ne.s32.totalorder %s1239_s26, %s1235_s25 }
   0xd   : > { %p30_p1 = scmp.eq.s32.totalorder %s29_s9, 0  ;;  %p40_p2 = scmp.eq.s32.totalorder %s1243_s27, 0 }
   0xe   : > { %p45_p3 = scmp.ne.s32.totalorder %s1235_s25, %s1231_s24  ;;  %p1616_p4 = scmp.eq.s32.totalorder %s1319_s28, 0 }
   0xf   : > { %s1335_s10 = scalar_select %p30_p1, %s1239_s26, %s32_s8  }
  0x10   : > { %p1337_p5 = por %p40_p2, %p39_p0  ;;  %p1343_p6 = por %p1616_p4, %p45_p3 }
  0x11   : > { %1626 = sst [smem:[#allocation17_spill]] %s1335_s10  ;;  %p195_p7 = scmp.eq.s32.totalorder %s1319_s28, 1 }
  0x12   : > { %s1627_s11 = scalar_select %p1337_p5, 1, 0 }
  0x13   : > { %s1628_s12 = scalar_select %p1343_p6, 1, 0 }
  0x14   : > { %p201_p8 = scmp.eq.s32.totalorder %s830_s29, 1  ;;  %p831_p9 = scmp.ge.s32.totalorder %s1243_s27, 1 }
  0x15   : > { %p208_p10 = scmp.lt.s32.totalorder %s1243_s27, 3  ;;  %p1350_p11 = por %p195_p7, %p39_p0 }
  0x16   : > { %p1354_p12 = por %p201_p8, %p45_p3  ;;  %s1245_s16 = smov [#allocation5]  }
  0x17   : > { %s1629_s13 = scalar_select %p1350_p11, 1, 0 }
  0x18   : > { %s1630_s14 = scalar_select %p1354_p12, 1, 0 }
  0x19   : > { %p1358_p13 = pnand %p831_p9, %p208_p10  ;;  %s220_s17 = sshll.u32 %s1245_s16, 4  ;;  %s221_s17 = int_to_ptr.vmem [resolvable:$true] %s220_s17 }
  0x1a   : > { %1631 = sst [smem:[#allocation18_spill]] %s1630_s14  ;;  %s1246_s19 = smov [#allocation7]  }
  0x1b   : > { %s1632_s15 = scalar_select %p1358_p13, 1, 0 }
  0x1c   : > { %p966_p1 = pneg %p1358_p13  ;;  %s236_s20 = sshll.u32 %s1246_s19, 4  ;;  %s1370_s20 = int_to_ptr.vmem [resolvable:$true] %s236_s20 }
  0x1d   : > { %s1634_s1 = sld [smem:[#allocation19_spill]] }
  0x1e   : > { %p1366_p2 = pnand %p966_p1, %p1616_p4 }
  0x20   : > { %p1380_p3 = pneg %p1366_p2 }
  0x23   : > { %s1057_s23 = scalar_lea.hbm %s1634_s1, 256 }
  0x24   : > { %p1058_p0 = scmp.ne.s32.totalorder %s1634_s1, %s1057_s23  ;;  %p1064_p9 = scmp.lt.u32.totalorder %s1057_s23, %s1634_s1 }
  0x26   : > { %p1060_p7 = pnand %p1380_p3, %p1058_p0 }
  0x28   : > { %p1061_p8 = pneg %p1060_p7 }
  0x2a   : > { %p1066_p10 = pnand %p1064_p9, %p1061_p8 }
  0x2c   : > { %1069 = shalt.err (!%p1066_p10)
}
  0x2d   : > { %s1070_s21 = scalar_lea.vmem %s221_s17, 256  ;;  %p1078_p11 = scmp.lt.s32.totalorder %s221_s17, %s221_s17 }
  0x2e   : > { %p1071_p1 = scmp.ne.s32.totalorder %s221_s17, %s1070_s21  ;;  %p1079_p6 = scmp.lt.s32.totalorder %s1070_s21, %s1070_s21 }
  0x30   : > { %p1073_p4 = pnand %p1071_p1, %p1380_p3  ;;  %p1080_p13 = por %p1079_p6, %p1078_p11 }
  0x32   : > { %p1074_p12 = pneg %p1073_p4 }
  0x34   : > { %p1081_p5 = pnand %p1080_p13, %p1074_p12 }
  0x36   : > { %1084 = shalt.err (!%p1081_p5)
}
  0x37   : > { %s1247_s22 = smov 64   ;;  %s1248_s29 = smov 4  }
  0x38   : > { %969 = dma.hbm_to_vmem [thread:$0]  (!%p1366_p2), %s1634_s1, 256, %s221_s17, [#allocation6], %s1247_s22, %s1247_s22, %s1248_s29  }
  0x39   : > { %s1085_s10 = scalar_lea.hbm %s1611_s3, 1024 }
  0x3a   : > { %p1086_p4 = scmp.ne.s32.totalorder %s1611_s3, %s1085_s10  ;;  %p1092_p11 = scmp.lt.u32.totalorder %s1085_s10, %s1611_s3 }
  0x3c   : > { %p1088_p5 = pnand %p1086_p4, %p1380_p3 }
  0x3e   : > { %p1089_p6 = pneg %p1088_p5 }
  0x40   : > { %p1094_p12 = pnand %p1092_p11, %p1089_p6 }
  0x42   : > { %1097 = shalt.err (!%p1094_p12)
}
  0x43   : > { %s1098_s17 = scalar_lea.vmem %s1370_s20, 1024  ;;  %p1106_p8 = scmp.lt.s32.totalorder %s1370_s20, %s1370_s20 }
  0x44   : > { %p1099_p13 = scmp.ne.s32.totalorder %s1370_s20, %s1098_s17  ;;  %p1107_p9 = scmp.lt.s32.totalorder %s1098_s17, %s1098_s17 }
  0x46   : > { %p1101_p0 = pnand %p1099_p13, %p1380_p3  ;;  %p1108_p10 = por %p1107_p9, %p1106_p8 }
  0x48   : > { %p1102_p7 = pneg %p1101_p0 }
  0x4a   : > { %p1109_p1 = pnand %p1108_p10, %p1102_p7 }
  0x4c   : > { %1112 = shalt.err (!%p1109_p1)
}
  0x4d   : > { %972 = dma.hbm_to_vmem [thread:$0]  (!%p1366_p2), %s1611_s3, 1024, %s1370_s20, [#allocation6], %s1247_s22, %s1247_s22, %s1248_s29  }
  0x4e   : > { %s1249_s10 = smov [#allocation8]   ;;  %s1113_s16 = scalar_lea.hbm %s1613_s5, 1024 }
  0x4f   : > { %s252_s14 = sshll.u32 %s1249_s10, 4  ;;  %p1114_p4 = scmp.ne.s32.totalorder %s1613_s5, %s1113_s16  ;;  %s253_s14 = int_to_ptr.vmem [resolvable:$true] %s252_s14 }
  0x50   : > { %p1120_p11 = scmp.lt.u32.totalorder %s1113_s16, %s1613_s5 }
  0x51   : > { %p1116_p5 = pnand %p1114_p4, %p1380_p3 }
  0x53   : > { %p1117_p6 = pneg %p1116_p5 }
  0x55   : > { %p1122_p12 = pnand %p1120_p11, %p1117_p6 }
  0x57   : > { %1125 = shalt.err (!%p1122_p12)
}
  0x58   : > { %s1126_s20 = scalar_lea.vmem %s253_s14, 1024  ;;  %p1134_p8 = scmp.lt.s32.totalorder %s253_s14, %s253_s14 }
  0x59   : > { %p1127_p13 = scmp.ne.s32.totalorder %s253_s14, %s1126_s20  ;;  %p1135_p9 = scmp.lt.s32.totalorder %s1126_s20, %s1126_s20 }
  0x5b   : > { %p1129_p0 = pnand %p1127_p13, %p1380_p3  ;;  %p1136_p10 = por %p1135_p9, %p1134_p8 }
  0x5d   : > { %p1130_p7 = pneg %p1129_p0 }
  0x5f   : > { %p1137_p1 = pnand %p1136_p10, %p1130_p7 }
  0x61   : > { %1140 = shalt.err (!%p1137_p1)
}
  0x62   : > { %975 = dma.hbm_to_vmem [thread:$0]  (!%p1366_p2), %s1613_s5, 1024, %s253_s14, [#allocation9], %s1247_s22, %s1247_s22, %s1248_s29  }
  0x63   : > { %p835_p4 = scmp.ge.s32.totalorder %s1243_s27, 2 }
  0x64   : > { %p1636_p3 = scmp.ne.s32.totalorder (!%p835_p4), %s1627_s11, 0 }
  0x65   : > { %265 = sbr.rel (%p835_p4) target bundleno = 143 (0x8f), region = 40 }
  0x6c   : > { %268 = sbr.rel (!%p1636_p3) target bundleno = 143 (0x8f), region = 44  ;;  %s269_s9 = sand.u32 (%p1636_p3), 1, %s1239_s26  }
  0x6d   : > { %s837_s30 = sshll.u32 (%p1636_p3), %s1243_s27, 1  ;;  %s836_s18 = sshll.u32 (%p1636_p3), %s269_s9, 3 }
  0x6e   : > { %s275_s10 = ssub.s32 (%p1636_p3), 3, %s837_s30  ;;  %s1456_s29 = scalar_lea.sflag (%p1636_p3), [#allocation3], %s269_s9 }
  0x6f   : > { %p276_p5 = scmp.lt.s32.totalorder (%p1636_p3), %s275_s10, 2  ;;  %s273_s14 = scalar_lea.vmem (%p1636_p3), [#allocation2], %s836_s18 }
  0x73   : > { %s1653_s10 = smov (!%p276_p5, %s275_s10), 2 }
  0x74   : > { %s1453_s23 = sshll.u32 %s1653_s10, 6 }
  0x75   : > { %s280_s22 = ssub.s32 128, %s1453_s23 }
  0x76   : > { %281 = vsyncadd %s1456_s29, %s280_s22  ;;  %p839_p2 = scmp.ne.s32.totalorder %s1453_s23, 0  ;;  %s881_s11 = sshll.u32 %s1243_s27, 7 }
  0x77   : > { %s1464_s19 = scalar_lea.hbm %s1608_s0, %s881_s11  ;;  %s286_s21 = sshll.u32 %s273_s14, 4  ;;  %s1466_s21 = int_to_ptr.vmem [resolvable:$true] %s286_s21 }
  0x78   : > { %s1141_s17 = scalar_lea.hbm %s1464_s19, %s1453_s23  ;;  %s1145_s24 = scalar_lea.hbm %s1608_s0, 192 }
  0x79   : > { %p1142_p6 = scmp.ne.s32.totalorder %s1464_s19, %s1141_s17  ;;  %p1146_p13 = scmp.lt.u32.totalorder %s1464_s19, %s1608_s0 }
  0x7a   : > { %p1147_p0 = scmp.lt.u32.totalorder %s1145_s24, %s1141_s17  ;;  %p1149_p8 = scmp.lt.u32.totalorder %s1141_s17, %s1464_s19 }
  0x7b   : > { %p1143_p11 = pnand %p1142_p6, %p839_p2 }
  0x7c   : > { %p1148_p7 = por %p1147_p0, %p1146_p13 }
  0x7d   : > { %p1144_p12 = pneg %p1143_p11 }
  0x7e   : > { %p1150_p9 = por %p1149_p8, %p1148_p7 }
  0x80   : > { %p1151_p10 = pnand %p1150_p9, %p1144_p12 }
  0x82   : > { %1154 = shalt.err (!%p1151_p10)
}
  0x83   : > { %s1155_s18 = scalar_lea.vmem %s1466_s21, %s1453_s23  ;;  %s1250_s10 = smov [#allocation2]  }
  0x84   : > { %p1156_p1 = scmp.ne.s32.totalorder %s1466_s21, %s1155_s18  ;;  %s1159_s22 = sshll.u32 %s1250_s10, 4  ;;  %s1160_s22 = int_to_ptr.vmem [resolvable:$false] %s1159_s22 }
  0x85   : > { %s1161_s14 = scalar_lea.vmem %s1160_s22, 256  ;;  %p1162_p6 = scmp.lt.s32.totalorder %s1466_s21, %s1160_s22 }
  0x86   : > { %p1157_p3 = pnand %p1156_p1, %p839_p2  ;;  %p1163_p11 = scmp.lt.s32.totalorder %s1161_s14, %s1155_s18 }
  0x88   : > { %p1158_p5 = pneg %p1157_p3  ;;  %p1164_p13 = por %p1163_p11, %p1162_p6 }
  0x8a   : > { %p1165_p0 = pnand %p1164_p13, %p1158_p5 }
  0x8c   : > { %1168 = shalt.err (!%p1165_p0)
}
  0x8d   : > { %s1251_s11 = smov 64   ;;  %s1252_s8 = smov 4  }
  0x8e   : > { %292 = dma.hbm_to_vmem [thread:$0]  (%p839_p2), %s1464_s19, %s1453_s23, %s1466_s21, %s1456_s29, %s1251_s11, %s1251_s11, %s1252_s8  }
  0x8f PF: > { %p1637_p12 = scmp.ne.s32.totalorder %s1632_s15, 0 }
  0x90   : > { %s1496_s16 = sand.u32 (!%p1637_p12), 1, %s1235_s25   ;;  %p1638_p7 = scmp.ne.s32.totalorder (!%p1637_p12), %s1628_s12, 0 }
  0x91   : > { %298 = sbr.rel (%p1637_p12) target bundleno = 893 (0x37d), region = 48  ;;  %s844_s17 = sshll.u32 (!%p1637_p12), %s1496_s16, 3 }
  0x92   : > { %s301_s20 = scalar_lea.sflag (!%p1637_p12), [#allocation3], %s1496_s16  ;;  %s304_s1 = scalar_lea.vmem (!%p1637_p12), [#allocation2], %s844_s17 }
  0x98   : > { %1214 = dma.done.wait (%p1638_p7), %s301_s20, 128  }
  0x99   : > { %1216 = vsyncadd (%p1638_p7), %s301_s20, 4294967168  ;;  %p1639_p2 = scmp.eq.s32.totalorder %s1319_s28, 0 }
  0x9b   : > { %1218 = dma.done.wait (%p1639_p2), [#allocation6], 1280   ;;  %p1640_p8 = pmov %p1639_p2 }
  0x9c   : > { %p1641_p9 = pmov %p1639_p2 }
  0x9d   : > { %1220 = vsyncadd (%p1640_p8), [#allocation6], 4294966016 }
  0x9e   : > { %1222 = dma.done.wait (%p1641_p9), [#allocation9], 1024   ;;  %p1642_p10 = pmov %p1639_p2 }
  0x9f   : > { %v1253_v0 = vmov 0.0   ;;  %vm1254_vm0 = vmmov 0   ;;  %v1030_v1 = vld [vmem:[#allocation5] sm:$0xff]   ;;  %v1031_v2 = vld [vmem:[#allocation5 + $0x8] sm:$0xff]   ;;  %v1033_v3 = vld [vmem:[#allocation7] sm:$0xff]   ;;  %vm388_vm1 = vcmask 261120   ;;  %v663_v60 = vlaneseq }
  0xa0   : > { %1224 = vsyncadd (%p1642_p10), [#allocation9], 4294966272  ;;  %904 = vmatprep.subr.bf16.mxu0 %v1253_v0  ;;  %908 = vmatprep.mubr.msk.bf16.mxu0 %vm1254_vm0, %v1253_v0  ;;  %v1032_v4 = vld [vmem:[%s304_s1] sm:$0xff]   ;;  %v1035_v6 = vld [vmem:[#allocation7 + $0x10] sm:$0xff]   ;;  %s848_s24 = sshll.u32 %s1496_s16, 4  ;;  %s709_s30 = scalar_lea.sflag [#allocation4], %s1496_s16 }
  0xa1   : > { %912 = vmatprep.subr.bf16.mxu1 %v1253_v0  ;;  %928 = vmatprep.mubr.msk.bf16.mxu1 %vm1254_vm0, %v1253_v0  ;;  %v1034_v5 = vld [vmem:[#allocation7 + $0x8] sm:$0xff]   ;;  %v1036_v7 = vld [vmem:[#allocation7 + $0x18] sm:$0xff]   ;;  %v1037_v8 = vld [vmem:[#allocation7 + $0x20] sm:$0xff]   ;;  %s346_s9 = scalar_lea.vmem [#allocation10], %s848_s24  ;;  %p1643_p1 = scmp.ne.s32.totalorder %s1629_s13, 0 }
  0xa2   : > { %905 = vmatpush3.bf16.msra.mxu0 %v1030_v1  ;;  %913 = vmatpush3.bf16.msra.mxu1 %v1033_v3  ;;  %v1038_v9 = vld [vmem:[#allocation7 + $0x28] sm:$0xff]   ;;  %v1039_v10 = vld [vmem:[#allocation7 + $0x30] sm:$0xff]   ;;  %v1040_v11 = vld [vmem:[#allocation7 + $0x38] sm:$0xff]   ;;  %s873_s18 = sshll.u32 (%p1643_p1), %s1319_s28, 1 }
  0xa3   : > { %906 = vmatprep.subr.bf16.mxu0 %v1253_v0  ;;  %914 = vmatprep.subr.bf16.mxu1 %v1253_v0  ;;  %v1041_v12 = vld [vmem:[#allocation8] sm:$0xff]   ;;  %v1042_v13 = vld [vmem:[#allocation8 + $0x8] sm:$0xff]   ;;  %v1043_v14 = vld [vmem:[#allocation8 + $0x10] sm:$0xff]   ;;  %s717_s10 = ssub.s32 (%p1643_p1), 3, %s873_s18 }
  0xa4   : > { %v1044_v15 = vld [vmem:[#allocation8 + $0x18] sm:$0xff]   ;;  %v1045_v16 = vld [vmem:[#allocation8 + $0x20] sm:$0xff]   ;;  %v1046_v17 = vld [vmem:[#allocation8 + $0x28] sm:$0xff]   ;;  %p718_p3 = scmp.lt.s32.totalorder (%p1643_p1), %s717_s10, 2 }
  0xa5   : > { %v849_v18 = vld [vmem:[%s1610_s2] ss:$0 sm:$0xff]  ;;  %v1047_v28 = vld [vmem:[#allocation8 + $0x30] sm:$0xff]   ;;  %v1048_v29 = vld [vmem:[#allocation8 + $0x38] sm:$0xff]  }
  0xa6   : > { %907 = vmatpush3.bf16.msra.mxu0 %v1031_v2  ;;  %915 = vmatpush3.bf16.msra.mxu1 %v1034_v5  ;;  %v854_v30 = vld [vmem:[%s1612_s4] ss:$0 sm:$0xff] }
  0xa7   : > { %932 = vmatprep.subr.bf16.mxu0 %v1253_v0  ;;  %916 = vmatprep.subr.bf16.mxu1 %v1253_v0  ;;  %v863_v40 = vld [vmem:[%s1614_s6] ss:$0 sm:$0xff] }
  0xa9   : > { %909 = vmatmul.mubr.msk.bf16.vlgmr.msra.gmra.mrb[0].mxu0 %vm388_vm1, %v1032_v4  ;;  %v664_v4 = vand.u32 127, %v663_v60 }
  0xaa   : > { %948 = vmatprep.mubr.msk.bf16.mxu0 %vm1254_vm0, %v1253_v0  ;;  %917 = vmatpush3.bf16.msra.mxu1 %v1035_v6 }
  0xab   : > { %918 = vmatprep.subr.bf16.mxu1 %v1253_v0  ;;  %933 = vmatpush3.bf16.msra.mxu0 %v1041_v12  ;;  %vm665_vm5 = vcmp.lt.s32.totalorder %v664_v4, 16 }
  0xac   : > { %934 = vmatprep.subr.bf16.mxu0 %v1253_v0 }
  0xae   : > { %919 = vmatpush3.bf16.msra.mxu1 %v1036_v7 }
  0xaf   : > { %920 = vmatprep.subr.bf16.mxu1 %v1253_v0  ;;  %935 = vmatpush3.bf16.msra.mxu0 %v1042_v13 }
  0xb0   : > { %936 = vmatprep.subr.bf16.mxu0 %v1253_v0 }
  0xb2   : > { %921 = vmatpush3.bf16.msra.mxu1 %v1037_v8 }
  0xb3   : > { %922 = vmatprep.subr.bf16.mxu1 %v1253_v0  ;;  %937 = vmatpush3.bf16.msra.mxu0 %v1043_v14 }
  0xb4   : > { %938 = vmatprep.subr.bf16.mxu0 %v1253_v0 }
  0xb6   : > { %923 = vmatpush3.bf16.msra.mxu1 %v1038_v9 }
  0xb7   : > { %924 = vmatprep.subr.bf16.mxu1 %v1253_v0  ;;  %939 = vmatpush3.bf16.msra.mxu0 %v1044_v15 }
  0xb8   : > { %940 = vmatprep.subr.bf16.mxu0 %v1253_v0 }
  0xba   : > { %925 = vmatpush3.bf16.msra.mxu1 %v1039_v10 }
  0xbb   : > { %926 = vmatprep.subr.bf16.mxu1 %v1253_v0  ;;  %941 = vmatpush3.bf16.msra.mxu0 %v1045_v16 }
  0xbc   : > { %942 = vmatprep.subr.bf16.mxu0 %v1253_v0 }
  0xbe   : > { %927 = vmatpush3.bf16.msra.mxu1 %v1040_v11 }
  0xbf   : > { %943 = vmatpush3.bf16.msra.mxu0 %v1046_v17 }
  0xc0   : > { %944 = vmatprep.subr.bf16.mxu0 %v1253_v0 }
  0xc3   : > { %945 = vmatpush3.bf16.msra.mxu0 %v1047_v28 }
  0xc4   : > { %946 = vmatprep.subr.bf16.mxu0 %v1253_v0 }
  0xc7   : > { %947 = vmatpush3.bf16.msra.mxu0 %v1048_v29 }
 0x17c   : > { %v426_v19 = vpop.f32.mrb[0].mxu0 }
 0x17d   : > { %v427_v20 = vadd.f32 %v849_v18, %v426_v19  ;;  %v910_v21 = vpop.f32.mrb[1].mxu0 }
 0x17e   : > { %v429_v22 = vpop.f32.mrb[2].mxu0 }
 0x17f   : > { %v430_v23 = vadd.f32 %v849_v18, %v429_v22  ;;  %v911_v24 = vpop.f32.mrb[3].mxu0  ;;  %v433_v25 = vmax.f32 %v427_v20, 0.0 }
 0x181   : > { %v434_v26 = vmax.f32 %v430_v23, 0.0 }
 0x183   : > { %v435_v27 = vpack.c.bf16 %v434_v26, %v433_v25 }
 0x185   : > { %929 = vmatmul.mubr.bf16.vlgmr.msra.gmra.mrb[0].mxu1 %v435_v27 }
 0x258   : > { %v541_v31 = vpop.f32.mrb[0].mxu1 }
 0x259   : > { %v542_v32 = vadd.f32 %v854_v30, %v541_v31  ;;  %v930_v33 = vpop.f32.mrb[1].mxu1 }
 0x25a   : > { %v544_v34 = vpop.f32.mrb[2].mxu1 }
 0x25b   : > { %v545_v35 = vadd.f32 %v854_v30, %v544_v34  ;;  %v931_v36 = vpop.f32.mrb[3].mxu1  ;;  %v548_v37 = vmax.f32 %v542_v32, 0.0 }
 0x25d   : > { %v549_v38 = vmax.f32 %v545_v35, 0.0 }
 0x25f   : > { %v550_v39 = vpack.c.bf16 %v549_v38, %v548_v37 }
 0x261   : > { %949 = vmatmul.mubr.bf16.vlgmr.msra.gmra.mrb[4].mxu0 %v550_v39 }
 0x334   : > { %v656_v41 = vpop.f32.mrb[4].mxu0 }
 0x335   : > { %v657_v42 = vadd.f32 %v863_v40, %v656_v41  ;;  %v950_v43 = vpop.f32.mrb[5].mxu0 }
 0x336   : > { %v659_v44 = vpop.f32.mrb[6].mxu0 }
 0x337   : > { %v672_v45 = vand.u32 2147483647, %v657_v42  ;;  %v660_v46 = vadd.f32 %v863_v40, %v659_v44  ;;  %v951_v47 = vpop.f32.mrb[7].mxu0  ;;  %v666_v5 = vmax.f32 %v657_v42, 0.0  ;;  %vm668_vm4 = vcmp.ne.f32.partialorder %v657_v42, %v657_v42 }
 0x339   : > { %v674_v48 = vsub.f32 0.0, %v672_v45  ;;  %v673_v49 = vand.u32 2147483647, %v660_v46  ;;  %v667_v10 = vmax.f32 %v660_v46, 0.0  ;;  %vm669_vm6 = vcmp.ne.f32.partialorder %v660_v46, %v660_v46 }
 0x33b   : > { %v676_v50 = vmul.f32 1.442695, %v674_v48  ;;  %v675_v51 = vsub.f32 0.0, %v673_v49 }
 0x33d   : > { %1049 = vpow2.f32 %v676_v50  ;;  %v678_v52 = vmul.f32 1.442695, %v675_v51 }
 0x33f   : > { %1051 = vpow2.f32 %v678_v52 }
 0x347   : > { %v1050_v53 = vpop.eup %1049 }
 0x348   : > { %v680_v54 = vadd.f32 1.0, %v1050_v53  ;;  %v683_v57 = vmul.f32 -0.5, %v1050_v53  ;;  %v686_v61 = vand.u32 2147483647, %v1050_v53 }
 0x349   : > { %v1052_v55 = vpop.eup %1051 }
 0x34a   : > { %1053 = vlog2.f32 %v680_v54  ;;  %v689_v56 = vadd.f32 1.0, %v1052_v55  ;;  %v692_v58 = vmul.f32 -0.5, %v1052_v55  ;;  %v684_v59 = vadd.f32 1.0, %v683_v57 }
 0x34b   : > { %v695_v0 = vand.u32 2147483647, %v1052_v55  ;;  %vm687_vm2 = vcmp.lt.f32.partialorder %v686_v61, 0.0004427343 }
 0x34c   : > { %1055 = vlog2.f32 %v689_v56  ;;  %v693_v62 = vadd.f32 1.0, %v692_v58  ;;  %v685_v2 = vmul.f32 %v1050_v53, %v684_v59 }
 0x34d   : > { %vm696_vm3 = vcmp.lt.f32.partialorder %v695_v0, 0.0004427343 }
 0x34e   : > { %v694_v8 = vmul.f32 %v1052_v55, %v693_v62 }
 0x354   : > { %v1054_v63 = vpop.eup %1053 }
 0x355   : > { %v682_v1 = vmul.f32 0.6931472, %v1054_v63 }
 0x356   : > { %v1056_v3 = vpop.eup %1055 }
 0x357   : > { %v688_v6 = vsel %vm687_vm2, %v685_v2, %v682_v1  ;;  %v691_v7 = vmul.f32 0.6931472, %v1056_v3 }
 0x358   : > { %v698_v9 = vadd.f32 %v688_v6, %v666_v5 }
 0x359   : > { %v697_v11 = vsel %vm696_vm3, %v694_v8, %v691_v7 }
 0x35a   : > { %v700_v12 = vsel %vm668_vm4, %v657_v42, %v698_v9  ;;  %v699_v13 = vadd.f32 %v697_v11, %v667_v10  ;;  %715 = sbr.rel (!%p1643_p1) target bundleno = 893 (0x37d), region = 68 }
 0x35b   : > { %v702_v14 = vadd.f32 1e-07, %v700_v12 }
 0x35c   : > { %v701_v15 = vsel %vm669_vm6, %v660_v46, %v699_v13 }
 0x35d   : > { %v704_v16 = vsel %vm665_vm5, %v657_v42, %v702_v14  ;;  %v703_v17 = vadd.f32 1e-07, %v701_v15 }
 0x35e   : > { %706 = vst [vmem:[%s346_s9] sm:$0xff] %v704_v16 }
 0x35f   : > { %v705_v18 = vsel %vm665_vm5, %v660_v46, %v703_v17 }
 0x360   : > { %707 = vst [vmem:[%s346_s9 + $0x8] sm:$0xff] %v705_v18 }
 0x361   : > { %s1655_s10 = smov (!%p718_p3, %s717_s10), 2 }
 0x362   : > { %s1550_s22 = sshll.u32 %s1655_s10, 7 }
 0x363   : > { %s722_s14 = ssub.s32 256, %s1550_s22 }
 0x364   : > { %723 = vsyncadd %s709_s30, %s722_s14  ;;  %p875_p5 = scmp.ne.s32.totalorder %s1550_s22, 0  ;;  %s882_s11 = sshll.u32 %s1319_s28, 8 }
 0x365   : > { %s1560_s17 = scalar_lea.hbm %s1615_s7, %s882_s11  ;;  %s728_s20 = sshll.u32 %s346_s9, 4  ;;  %s1562_s20 = int_to_ptr.vmem [resolvable:$true] %s728_s20 }
 0x366   : > { %s1169_s1 = scalar_lea.vmem %s1562_s20, %s1550_s22  ;;  %s1255_s12 = smov [#allocation10]  }
 0x367   : > { %p1170_p6 = scmp.ne.s32.totalorder %s1562_s20, %s1169_s1  ;;  %s1173_s15 = sshll.u32 %s1255_s12, 4  ;;  %s1174_s15 = int_to_ptr.vmem [resolvable:$false] %s1173_s15 }
 0x368   : > { %s1175_s28 = scalar_lea.vmem %s1174_s15, 512  ;;  %p1176_p0 = scmp.lt.s32.totalorder %s1562_s20, %s1174_s15 }
 0x369   : > { %p1171_p11 = pnand %p1170_p6, %p875_p5  ;;  %p1177_p12 = scmp.lt.s32.totalorder %s1175_s28, %s1169_s1 }
 0x36b   : > { %p1172_p13 = pneg %p1171_p11  ;;  %p1178_p7 = por %p1177_p12, %p1176_p0 }
 0x36d   : > { %p1179_p2 = pnand %p1178_p7, %p1172_p13 }
 0x36f   : > { %1182 = shalt.err (!%p1179_p2)
}
 0x370   : > { %s1183_s23 = scalar_lea.hbm %s1560_s17, %s1550_s22  ;;  %s1187_s21 = scalar_lea.hbm %s1615_s7, 384 }
 0x371   : > { %p1184_p8 = scmp.ne.s32.totalorder %s1560_s17, %s1183_s23  ;;  %p1188_p1 = scmp.lt.u32.totalorder %s1560_s17, %s1615_s7 }
 0x372   : > { %p1189_p3 = scmp.lt.u32.totalorder %s1187_s21, %s1183_s23  ;;  %p1191_p11 = scmp.lt.u32.totalorder %s1183_s23, %s1560_s17 }
 0x373   : > { %p1185_p9 = pnand %p1184_p8, %p875_p5 }
 0x374   : > { %p1190_p6 = por %p1189_p3, %p1188_p1 }
 0x375   : > { %p1186_p10 = pneg %p1185_p9 }
 0x376   : > { %p1192_p13 = por %p1191_p11, %p1190_p6 }
 0x378   : > { %p1193_p0 = pnand %p1192_p13, %p1186_p10 }
 0x37a   : > { %1196 = shalt.err (!%p1193_p0)
}
 0x37b   : > { %s1256_s18 = smov 128   ;;  %s1257_s10 = smov 8  }
 0x37c   : > { %734 = dma.vmem_to_hbm [thread:$0]  (%p875_p5), %s1562_s20, %s1550_s22, %s1560_s17, %s709_s30, %s1256_s18, %s1256_s18, %s1257_s10  }
 0x37d PF: > { %s1644_s14 = sld [smem:[#allocation15_spill]]  ;;  %s1645_s11 = sld [smem:[#allocation18_spill]] }
 0x383   : > { %s743_s13 = sand.u32 1, %s1644_s14   ;;  %p1646_p12 = scmp.ne.s32.totalorder %s1645_s11, 0 }
 0x384   : > { %s744_s8 = scalar_lea.sflag [#allocation4], %s743_s13 }
 0x385   : > { %p977_p7 = pnand %p835_p4, %p1646_p12 }
 0x387   : > { %1226 = dma.done.wait (!%p977_p7), %s744_s8, 256  }
 0x388   : > { %1228 = vsyncadd (!%p977_p7), %s744_s8, 4294967040  ;;  %s1647_s27 = sld [smem:[#allocation16_spill]]  ;;  %s1648_s1 = sld [smem:[#allocation17_spill]] }
 0x389   : > { %s1649_s24 = smov %s1235_s25  ;;  %s1650_s25 = smov %s1239_s26 }
 0x38e   : > { %p22_p2 = scmp.ge.s32.totalorder %s1647_s27, 4   ;;  %s1651_s26 = smov %s1648_s1 }
 0x390   :  { %24 = sbr.rel (!%p22_p2) target bundleno = 9 (0x9), region = 105 }
 0x397   :  { %749 = vsyncpa [#allocation3], 1 }
 0x398   :  { %751 = vsyncpa [#allocation3 + $0x1], 1 }
 0x399   :  { %752 = vsyncpa [#allocation6], 1 }
 0x39a   :  { %753 = vsyncpa [#allocation9], 1 }
 0x39b   :  { %754 = vsyncpa [#allocation4], 1 }
 0x39c   :  { %756 = vsyncpa [#allocation4 + $0x1], 1 }

</bundles_post_ra>
